<compile_context>
chip_gen: v7x
topology: tpu7x:2x2x1
jax: 0.10.0
libtpu: 0.0.40
codegen_flags: <defaults>
</compile_context>

<pallas_src>
import jax
import jax.numpy as jnp
from jax.experimental import pallas as pl
from jax.experimental.pallas import tpu as pltpu

# ---------------- model hyperparams (synthetic, small) ----------------
B = 2            # batch
T = 8            # action horizon (sequence)
D_OBS = 32       # obs-encoder embedding dim
D_GOAL = 32      # goal embedding dim
D_ACT = 4        # action dim
EMB = 16         # sigma (time) embedding dim
HID = 64         # MLP hidden dim
SIGMA_DATA = 0.5

D_IN = D_ACT + D_OBS + D_GOAL + EMB     # 84 (raw, unpadded)

ACT_PAD = 128    # lane-dense action slab (K of the action sub-matmul + skip lanes)
OUT_PAD = 128    # lane-dense output slab (only first D_ACT lanes meaningful)

# packed-W1 row layout: [act(128-pad) | obs(32) | goal(32) | emb(16) | b1 row (8-pad)]
R_ACT = 0
R_OBS = ACT_PAD                         # 128
R_GOAL = ACT_PAD + D_OBS                # 160
R_EMB = ACT_PAD + D_OBS + D_GOAL        # 192
R_B1 = R_EMB + EMB                      # 208
W1_ROWS = R_B1 + 8                      # 216
W2_ROWS = HID + 8                       # 72   (row HID = b2)
W3_ROWS = HID + 8                       # 72   (row HID = b3)


# ---------------- Pallas kernel: fused Karras scalings + 3-layer MLP ---------
def denoiser_kernel(sigma_ref,                          # SMEM [B] f32 (scalar prefetch)
                    act_ref, obs_ref, goal_ref, temb_ref,
                    w1_ref, w2_ref, w3_ref,             # packed bf16 weight slabs
                    o_ref):
    b = pl.program_id(0)
    f32 = jnp.float32
    sd2 = f32(SIGMA_DATA * SIGMA_DATA)

    # Karras preconditioning scalars for this batch element, computed on the
    # VPU/EUP from the SMEM-resident sigma (kept as (1,1) vectors so rsqrt
    # lowers to the EUP path on every TPU generation).
    sig_v = jnp.full((1, 1), sigma_ref[b], f32)
    inv = jax.lax.rsqrt(sig_v * sig_v + sd2)            # 1/sqrt(sigma^2+sd^2)
    c_in = inv
    c_skip = sd2 * (inv * inv)
    c_out = f32(SIGMA_DATA) * sig_v * inv

    act = act_ref[0]       # [T, 128] f32 (lanes >= D_ACT are zero)
    obs = obs_ref[0]       # [T, D_OBS]
    goal = goal_ref[0]     # [T, D_GOAL]
    temb = temb_ref[0]     # [1, EMB]

    def mm(x, w):          # bf16 MXU feed, f32 accumulation
        return jnp.dot(x.astype(jnp.bfloat16), w, preferred_element_type=f32)

    # layer 1: h1 = (c_in*act)@W1a + obs@W1o + goal@W1g + temb@W1e + b1
    h1 = mm(c_in * act, w1_ref[R_ACT:R_ACT + ACT_PAD, :])
    h1 = h1 + mm(obs, w1_ref[R_OBS:R_OBS + D_OBS, :])
    h1 = h1 + mm(goal, w1_ref[R_GOAL:R_GOAL + D_GOAL, :])
    h1 = h1 + mm(temb, w1_ref[R_EMB:R_EMB + EMB, :])
    h1 = h1 + w1_ref[R_B1:R_B1 + 1, :].astype(f32)
    h1 = jax.nn.gelu(h1, approximate=True)              # f32 on VPU/EUP

    # layer 2
    h2 = mm(h1, w2_ref[0:HID, :]) + w2_ref[HID:HID + 1, :].astype(f32)
    h2 = jax.nn.gelu(h2, approximate=True)

    # layer 3 (output cols >= D_ACT are zero by construction of w3p/b3p)
    h3 = mm(h2, w3_ref[0:HID, :]) + w3_ref[HID:HID + 1, :].astype(f32)   # [T, 128]

    # Karras mix; lane-dense unmasked store of the full (T, 128) slab.
    o_ref[0] = c_skip * act + c_out * h3


def denoiser_pallas(sigma, act_p, obs, goal, temb, packed):
    w1p, w2p, w3p = packed
    Bq, Tq, _ = act_p.shape
    grid_spec = pltpu.PrefetchScalarGridSpec(
        num_scalar_prefetch=1,                      # sigma -> SMEM
        grid=(Bq,),
        in_specs=[
            pl.BlockSpec((1, Tq, ACT_PAD), lambda b, sig: (b, 0, 0)),
            pl.BlockSpec((1, Tq, D_OBS), lambda b, sig: (b, 0, 0)),
            pl.BlockSpec((1, Tq, D_GOAL), lambda b, sig: (b, 0, 0)),
            pl.BlockSpec((1, 1, EMB), lambda b, sig: (b, 0, 0)),
            pl.BlockSpec((W1_ROWS, HID), lambda b, sig: (0, 0)),     # VMEM-resident
            pl.BlockSpec((W2_ROWS, HID), lambda b, sig: (0, 0)),
            pl.BlockSpec((W3_ROWS, OUT_PAD), lambda b, sig: (0, 0)),
        ],
        out_specs=pl.BlockSpec((1, Tq, OUT_PAD), lambda b, sig: (b, 0, 0)),
    )
    return pl.pallas_call(
        denoiser_kernel,
        out_shape=jax.ShapeDtypeStruct((Bq, Tq, OUT_PAD), jnp.float32),
        grid_spec=grid_spec,
        compiler_params=pltpu.CompilerParams(
            dimension_semantics=("parallel",)),
    )(sigma, act_p, obs, goal, temb, w1p, w2p, w3p)


# ---------------- JAX glue (minimal): lane padding + tiny sigma embedding ----
def beso_forward(obs, action, goal, sigma, packed):
    """obs:[B,T,D_OBS]  action:[B,T,D_ACT]  goal:[B,T,D_GOAL]  sigma:[B]"""
    Bq, Tq, _ = action.shape
    sigma = sigma.astype(jnp.float32)

    # lane-dense action slab (used for both the W1 sub-matmul and the skip term)
    act_p = jnp.zeros((Bq, Tq, ACT_PAD), jnp.float32).at[..., :D_ACT].set(
        action.astype(jnp.float32))

    # sinusoidal embedding of c_noise = log(sigma)/4 — only [B, EMB] values, so
    # it is kept as tiny JAX glue (sin/cos lowering in-kernel is not needed).
    half = EMB // 2
    c_noise = 0.25 * jnp.log(sigma)
    freqs = jnp.exp(-jnp.log(10000.0) * jnp.arange(half, dtype=jnp.float32)
                    / (half - 1))
    t = c_noise[:, None] * freqs[None, :]                       # [B, half]
    temb = jnp.concatenate([jnp.sin(t), jnp.cos(t)], axis=-1)   # [B, EMB]
    temb = temb[:, None, :]                                     # [B, 1, EMB]

    out = denoiser_pallas(sigma, act_p,
                          obs.astype(jnp.float32), goal.astype(jnp.float32),
                          temb, packed)
    return out[..., :D_ACT]                                     # drop lane padding


# ---------------- pure-JAX f32 reference (same semantics) --------------------
def beso_forward_ref(obs, action, goal, sigma, raw):
    w1, b1, w2, b2, w3, b3 = raw
    sig = sigma.reshape(-1, 1, 1).astype(jnp.float32)
    sd2 = SIGMA_DATA ** 2
    c_skip = sd2 / (sig ** 2 + sd2)
    c_out = sig * SIGMA_DATA * jax.lax.rsqrt(sig ** 2 + sd2)
    c_in = jax.lax.rsqrt(sig ** 2 + sd2)
    c_noise = jnp.log(sig) * 0.25
    half = EMB // 2
    freqs = jnp.exp(-jnp.log(10000.0) * jnp.arange(half, dtype=jnp.float32)
                    / (half - 1))
    t = c_noise.reshape(-1, 1) * freqs[None, :]
    temb = jnp.concatenate([jnp.sin(t), jnp.cos(t)], axis=-1)
    temb = jnp.broadcast_to(temb[:, None, :], obs.shape[:2] + (EMB,))
    x = jnp.concatenate([c_in * action, obs, goal, temb], axis=-1)
    # TODO(synk): PyTorch nn.GELU defaults to the exact erf form; the tanh
    # approximation is used here (and in the kernel) for TPU-friendly lowering.
    h1 = jax.nn.gelu(x @ w1 + b1, approximate=True)
    h2 = jax.nn.gelu(h1 @ w2 + b2, approximate=True)
    h3 = h2 @ w3 + b3
    return c_skip * action + c_out * h3


# ---------------- deterministic parameter init + packing ---------------------
def init_params(key):
    k1, k2, k3 = jax.random.split(key, 3)

    def lin(k, fan_in, fan_out):
        scale = 1.0 / jnp.sqrt(jnp.float32(fan_in))
        w = jax.random.normal(k, (fan_in, fan_out), jnp.float32) * scale
        b = jnp.zeros((1, fan_out), jnp.float32)
        return w, b

    w1, b1 = lin(k1, D_IN, HID)      # rows ordered [act | obs | goal | emb]
    w2, b2 = lin(k2, HID, HID)
    w3, b3 = lin(k3, HID, D_ACT)
    return (w1, b1, w2, b2, w3, b3)


def pack_params(raw):
    """Pack the 6 f32 params into 3 bf16 slabs (biases folded as extra rows)."""
    w1, b1, w2, b2, w3, b3 = raw
    w1p = jnp.zeros((W1_ROWS, HID), jnp.float32)
    w1p = w1p.at[R_ACT:R_ACT + D_ACT, :].set(w1[0:D_ACT])                 # 4 real K rows, rest zero-pad to 128
    w1p = w1p.at[R_OBS:R_OBS + D_OBS, :].set(w1[D_ACT:D_ACT + D_OBS])
    w1p = w1p.at[R_GOAL:R_GOAL + D_GOAL, :].set(w1[D_ACT + D_OBS:D_ACT + D_OBS + D_GOAL])
    w1p = w1p.at[R_EMB:R_EMB + EMB, :].set(w1[D_ACT + D_OBS + D_GOAL:])
    w1p = w1p.at[R_B1, :].set(b1[0])

    w2p = jnp.zeros((W2_ROWS, HID), jnp.float32)
    w2p = w2p.at[0:HID, :].set(w2)
    w2p = w2p.at[HID, :].set(b2[0])

    w3p = jnp.zeros((W3_ROWS, OUT_PAD), jnp.float32)     # cols >= D_ACT stay zero (lane-dense output)
    w3p = w3p.at[0:HID, 0:D_ACT].set(w3)
    w3p = w3p.at[HID, 0:D_ACT].set(b3[0])

    return (w1p.astype(jnp.bfloat16),
            w2p.astype(jnp.bfloat16),
            w3p.astype(jnp.bfloat16))


# TODO(synk): the vision obs_encoder (ResNet over NCHW images) is only used in
# loss/get_embedding, not in BesoPolicy.forward, so it is not implemented here.

if __name__ == "__main__":
    key = jax.random.PRNGKey(0)
    kp, ko, ka, kg, ks = jax.random.split(key, 5)
    raw = init_params(kp)
    packed = pack_params(raw)

    obs = jax.random.normal(ko, (B, T, D_OBS), jnp.float32)
    action = jax.random.normal(ka, (B, T, D_ACT), jnp.float32)
    goal = jax.random.normal(kg, (B, T, D_GOAL), jnp.float32)
    sigma = jnp.exp(jax.random.normal(ks, (B,), jnp.float32))  # positive sigmas

    pred = jax.jit(beso_forward)(obs, action, goal, sigma, packed)
    jax.block_until_ready(pred)

    ref = beso_forward_ref(obs, action, goal, sigma, raw)

    assert pred.shape == (B, T, D_ACT), pred.shape
    assert jnp.all(jnp.isfinite(pred))
    max_err = float(jnp.max(jnp.abs(pred - ref)))
    # bf16 MXU inputs vs. f32 reference -> loose tolerance
    assert max_err < 0.15, f"max abs err vs f32 reference: {max_err}"
    print("KERNEL_OK")
</pallas_src>

<mosaic_0001>
module attributes {stable_mosaic.version = 11 : i64} {
  func.func @denoiser_kernel(%arg0: i32, %arg1: memref<2xf32, #tpu.memory_space<smem>>, %arg2: memref<1x8x128xf32, #tpu.memory_space<vmem>>, %arg3: memref<1x8x32xf32, #tpu.memory_space<vmem>>, %arg4: memref<1x8x32xf32, #tpu.memory_space<vmem>>, %arg5: memref<1x1x16xf32, #tpu.memory_space<vmem>>, %arg6: memref<216x64xbf16, #tpu.memory_space<vmem>>, %arg7: memref<72x64xbf16, #tpu.memory_space<vmem>>, %arg8: memref<72x128xbf16, #tpu.memory_space<vmem>>, %arg9: memref<1x8x128xf32, #tpu.memory_space<vmem>>) attributes {dimension_semantics = [#tpu.dimension_semantics<parallel>], iteration_bounds = array<i64: 2>, scalar_prefetch = 1 : i64, scratch_operands = 0 : i64, tpu.core_type = #tpu.core_type<tc>, window_params = [{transform_indices = @transform_0, window_bounds = array<i64: 1, 8, 128>}, {transform_indices = @transform_1, window_bounds = array<i64: 1, 8, 32>}, {transform_indices = @transform_2, window_bounds = array<i64: 1, 8, 32>}, {transform_indices = @transform_3, window_bounds = array<i64: 1, 1, 16>}, {pipeline_mode = #tpu.pipeline_mode<synchronous>, transform_indices = @transform_4, window_bounds = array<i64: 216, 64>}, {pipeline_mode = #tpu.pipeline_mode<synchronous>, transform_indices = @transform_5, window_bounds = array<i64: 72, 64>}, {pipeline_mode = #tpu.pipeline_mode<synchronous>, transform_indices = @transform_6, window_bounds = array<i64: 72, 128>}, {transform_indices = @transform_7, window_bounds = array<i64: 1, 8, 128>}]} {
    %0 = arith.index_cast %arg0 : i32 to index
    %1 = memref.load %arg1[%0] : memref<2xf32, #tpu.memory_space<smem>>
    %2 = vector.broadcast %1 : f32 to vector<1x1xf32>
    %3 = arith.mulf %2, %2 : vector<1x1xf32>
    %cst = arith.constant 2.500000e-01 : f32
    %4 = vector.broadcast %cst : f32 to vector<1x1xf32>
    %5 = arith.addf %3, %4 : vector<1x1xf32>
    %6 = math.rsqrt %5 : vector<1x1xf32>
    %7 = arith.mulf %6, %6 : vector<1x1xf32>
    %cst_0 = arith.constant 2.500000e-01 : f32
    %8 = vector.broadcast %cst_0 : f32 to vector<1x1xf32>
    %9 = arith.mulf %8, %7 : vector<1x1xf32>
    %cst_1 = arith.constant 5.000000e-01 : f32
    %10 = vector.broadcast %cst_1 : f32 to vector<1x1xf32>
    %11 = arith.mulf %10, %2 : vector<1x1xf32>
    %12 = arith.mulf %11, %6 : vector<1x1xf32>
    %c0 = arith.constant 0 : index
    %c0_2 = arith.constant 0 : index
    %c0_3 = arith.constant 0 : index
    %13 = vector.load %arg2[%c0, %c0_2, %c0_3] : memref<1x8x128xf32, #tpu.memory_space<vmem>>, vector<1x8x128xf32>
    %14 = vector.shape_cast %13 : vector<1x8x128xf32> to vector<8x128xf32>
    %c0_4 = arith.constant 0 : index
    %c0_5 = arith.constant 0 : index
    %c0_6 = arith.constant 0 : index
    %15 = vector.load %arg3[%c0_4, %c0_5, %c0_6] : memref<1x8x32xf32, #tpu.memory_space<vmem>>, vector<1x8x32xf32>
    %16 = vector.shape_cast %15 : vector<1x8x32xf32> to vector<8x32xf32>
    %c0_7 = arith.constant 0 : index
    %c0_8 = arith.constant 0 : index
    %c0_9 = arith.constant 0 : index
    %17 = vector.load %arg4[%c0_7, %c0_8, %c0_9] : memref<1x8x32xf32, #tpu.memory_space<vmem>>, vector<1x8x32xf32>
    %18 = vector.shape_cast %17 : vector<1x8x32xf32> to vector<8x32xf32>
    %c0_10 = arith.constant 0 : index
    %c0_11 = arith.constant 0 : index
    %c0_12 = arith.constant 0 : index
    %19 = vector.load %arg5[%c0_10, %c0_11, %c0_12] : memref<1x1x16xf32, #tpu.memory_space<vmem>>, vector<1x1x16xf32>
    %20 = vector.shape_cast %19 : vector<1x1x16xf32> to vector<1x16xf32>
    %21 = vector.broadcast %6 : vector<1x1xf32> to vector<8x128xf32>
    %22 = arith.mulf %21, %14 : vector<8x128xf32>
    %c0_13 = arith.constant 0 : index
    %c0_14 = arith.constant 0 : index
    %23 = vector.load %arg6[%c0_13, %c0_14] : memref<216x64xbf16, #tpu.memory_space<vmem>>, vector<128x64xbf16>
    %24 = arith.truncf %22 : vector<8x128xf32> to vector<8x128xbf16>
    %cst_15 = arith.constant dense<0.000000e+00> : vector<8x64xf32>
    %25 = tpu.matmul %24, %23, %cst_15 {dimension_numbers = #tpu.dot_dimension_numbers<[1], [0], [0], [1], [0, 0, 1, 1], [], []>} : vector<8x128xbf16>, vector<128x64xbf16>, vector<8x64xf32> -> vector<8x64xf32>
    %c128 = arith.constant 128 : index
    %c0_16 = arith.constant 0 : index
    %26 = vector.load %arg6[%c128, %c0_16] : memref<216x64xbf16, #tpu.memory_space<vmem>>, vector<32x64xbf16>
    %27 = arith.truncf %16 : vector<8x32xf32> to vector<8x32xbf16>
    %cst_17 = arith.constant dense<0.000000e+00> : vector<8x64xf32>
    %28 = tpu.matmul %27, %26, %cst_17 {dimension_numbers = #tpu.dot_dimension_numbers<[1], [0], [0], [1], [0, 0, 1, 1], [], []>} : vector<8x32xbf16>, vector<32x64xbf16>, vector<8x64xf32> -> vector<8x64xf32>
    %29 = arith.addf %25, %28 : vector<8x64xf32>
    %c160 = arith.constant 160 : index
    %c0_18 = arith.constant 0 : index
    %30 = vector.load %arg6[%c160, %c0_18] : memref<216x64xbf16, #tpu.memory_space<vmem>>, vector<32x64xbf16>
    %31 = arith.truncf %18 : vector<8x32xf32> to vector<8x32xbf16>
    %cst_19 = arith.constant dense<0.000000e+00> : vector<8x64xf32>
    %32 = tpu.matmul %31, %30, %cst_19 {dimension_numbers = #tpu.dot_dimension_numbers<[1], [0], [0], [1], [0, 0, 1, 1], [], []>} : vector<8x32xbf16>, vector<32x64xbf16>, vector<8x64xf32> -> vector<8x64xf32>
    %33 = arith.addf %29, %32 : vector<8x64xf32>
    %c192 = arith.constant 192 : index
    %c0_20 = arith.constant 0 : index
    %34 = vector.load %arg6[%c192, %c0_20] : memref<216x64xbf16, #tpu.memory_space<vmem>>, vector<16x64xbf16>
    %35 = arith.truncf %20 : vector<1x16xf32> to vector<1x16xbf16>
    %cst_21 = arith.constant dense<0.000000e+00> : vector<1x64xf32>
    %36 = tpu.matmul %35, %34, %cst_21 {dimension_numbers = #tpu.dot_dimension_numbers<[1], [0], [0], [1], [0, 0, 1, 1], [], []>} : vector<1x16xbf16>, vector<16x64xbf16>, vector<1x64xf32> -> vector<1x64xf32>
    %37 = vector.broadcast %36 : vector<1x64xf32> to vector<8x64xf32>
    %38 = arith.addf %33, %37 : vector<8x64xf32>
    %c208 = arith.constant 208 : index
    %c0_22 = arith.constant 0 : index
    %39 = vector.load %arg6[%c208, %c0_22] : memref<216x64xbf16, #tpu.memory_space<vmem>>, vector<1x64xbf16>
    %40 = arith.extf %39 : vector<1x64xbf16> to vector<1x64xf32>
    %41 = vector.broadcast %40 : vector<1x64xf32> to vector<8x64xf32>
    %42 = arith.addf %38, %41 : vector<8x64xf32>
    %43 = arith.mulf %42, %42 : vector<8x64xf32>
    %44 = arith.mulf %42, %43 : vector<8x64xf32>
    %cst_23 = arith.constant 4.471500e-02 : f32
    %45 = vector.broadcast %cst_23 : f32 to vector<8x64xf32>
    %46 = arith.mulf %45, %44 : vector<8x64xf32>
    %47 = arith.addf %42, %46 : vector<8x64xf32>
    %cst_24 = arith.constant 0.797884583 : f32
    %48 = vector.broadcast %cst_24 : f32 to vector<8x64xf32>
    %49 = arith.mulf %48, %47 : vector<8x64xf32>
    %50 = math.tanh %49 : vector<8x64xf32>
    %cst_25 = arith.constant 1.000000e+00 : f32
    %51 = vector.broadcast %cst_25 : f32 to vector<8x64xf32>
    %52 = arith.addf %51, %50 : vector<8x64xf32>
    %cst_26 = arith.constant 5.000000e-01 : f32
    %53 = vector.broadcast %cst_26 : f32 to vector<8x64xf32>
    %54 = arith.mulf %53, %52 : vector<8x64xf32>
    %55 = arith.mulf %42, %54 : vector<8x64xf32>
    %c0_27 = arith.constant 0 : index
    %c0_28 = arith.constant 0 : index
    %56 = vector.load %arg7[%c0_27, %c0_28] : memref<72x64xbf16, #tpu.memory_space<vmem>>, vector<64x64xbf16>
    %57 = arith.truncf %55 : vector<8x64xf32> to vector<8x64xbf16>
    %cst_29 = arith.constant dense<0.000000e+00> : vector<8x64xf32>
    %58 = tpu.matmul %57, %56, %cst_29 {dimension_numbers = #tpu.dot_dimension_numbers<[1], [0], [0], [1], [0, 0, 1, 1], [], []>} : vector<8x64xbf16>, vector<64x64xbf16>, vector<8x64xf32> -> vector<8x64xf32>
    %c64 = arith.constant 64 : index
    %c0_30 = arith.constant 0 : index
    %59 = vector.load %arg7[%c64, %c0_30] : memref<72x64xbf16, #tpu.memory_space<vmem>>, vector<1x64xbf16>
    %60 = arith.extf %59 : vector<1x64xbf16> to vector<1x64xf32>
    %61 = vector.broadcast %60 : vector<1x64xf32> to vector<8x64xf32>
    %62 = arith.addf %58, %61 : vector<8x64xf32>
    %63 = arith.mulf %62, %62 : vector<8x64xf32>
    %64 = arith.mulf %62, %63 : vector<8x64xf32>
    %cst_31 = arith.constant 4.471500e-02 : f32
    %65 = vector.broadcast %cst_31 : f32 to vector<8x64xf32>
    %66 = arith.mulf %65, %64 : vector<8x64xf32>
    %67 = arith.addf %62, %66 : vector<8x64xf32>
    %cst_32 = arith.constant 0.797884583 : f32
    %68 = vector.broadcast %cst_32 : f32 to vector<8x64xf32>
    %69 = arith.mulf %68, %67 : vector<8x64xf32>
    %70 = math.tanh %69 : vector<8x64xf32>
    %cst_33 = arith.constant 1.000000e+00 : f32
    %71 = vector.broadcast %cst_33 : f32 to vector<8x64xf32>
    %72 = arith.addf %71, %70 : vector<8x64xf32>
    %cst_34 = arith.constant 5.000000e-01 : f32
    %73 = vector.broadcast %cst_34 : f32 to vector<8x64xf32>
    %74 = arith.mulf %73, %72 : vector<8x64xf32>
    %75 = arith.mulf %62, %74 : vector<8x64xf32>
    %c0_35 = arith.constant 0 : index
    %c0_36 = arith.constant 0 : index
    %76 = vector.load %arg8[%c0_35, %c0_36] : memref<72x128xbf16, #tpu.memory_space<vmem>>, vector<64x128xbf16>
    %77 = arith.truncf %75 : vector<8x64xf32> to vector<8x64xbf16>
    %cst_37 = arith.constant dense<0.000000e+00> : vector<8x128xf32>
    %78 = tpu.matmul %77, %76, %cst_37 {dimension_numbers = #tpu.dot_dimension_numbers<[1], [0], [0], [1], [0, 0, 1, 1], [], []>} : vector<8x64xbf16>, vector<64x128xbf16>, vector<8x128xf32> -> vector<8x128xf32>
    %c64_38 = arith.constant 64 : index
    %c0_39 = arith.constant 0 : index
    %79 = vector.load %arg8[%c64_38, %c0_39] : memref<72x128xbf16, #tpu.memory_space<vmem>>, vector<1x128xbf16>
    %80 = arith.extf %79 : vector<1x128xbf16> to vector<1x128xf32>
    %81 = vector.broadcast %80 : vector<1x128xf32> to vector<8x128xf32>
    %82 = arith.addf %78, %81 : vector<8x128xf32>
    %83 = vector.broadcast %9 : vector<1x1xf32> to vector<8x128xf32>
    %84 = arith.mulf %83, %14 : vector<8x128xf32>
    %85 = vector.broadcast %12 : vector<1x1xf32> to vector<8x128xf32>
    %86 = arith.mulf %85, %82 : vector<8x128xf32>
    %87 = arith.addf %84, %86 : vector<8x128xf32>
    %c0_40 = arith.constant 0 : index
    %c0_41 = arith.constant 0 : index
    %c0_42 = arith.constant 0 : index
    %88 = vector.load %arg9[%c0_40, %c0_41, %c0_42] : memref<1x8x128xf32, #tpu.memory_space<vmem>>, vector<1x8x128xf32>
    %89 = vector.shape_cast %88 : vector<1x8x128xf32> to vector<8x128xf32>
    %90 = vector.shape_cast %87 : vector<8x128xf32> to vector<1x8x128xf32>
    tpu.vector_store %arg9[%c0_40, %c0_41, %c0_42], %90 {strides = array<i32>} : memref<1x8x128xf32, #tpu.memory_space<vmem>>, vector<1x8x128xf32>,
    return
  }
  func.func @transform_0(%arg0: i32, %arg1: memref<2xf32, #tpu.memory_space<smem>>) -> (i32, i32, i32) {
    %c0_i32 = arith.constant 0 : i32
    %c0_i32_0 = arith.constant 0 : i32
    %c0_i32_1 = arith.constant 0 : i32
    return %arg0, %c0_i32, %c0_i32_0 : i32, i32, i32
  }
  func.func @transform_1(%arg0: i32, %arg1: memref<2xf32, #tpu.memory_space<smem>>) -> (i32, i32, i32) {
    %c0_i32 = arith.constant 0 : i32
    %c0_i32_0 = arith.constant 0 : i32
    %c0_i32_1 = arith.constant 0 : i32
    return %arg0, %c0_i32, %c0_i32_0 : i32, i32, i32
  }
  func.func @transform_2(%arg0: i32, %arg1: memref<2xf32, #tpu.memory_space<smem>>) -> (i32, i32, i32) {
    %c0_i32 = arith.constant 0 : i32
    %c0_i32_0 = arith.constant 0 : i32
    %c0_i32_1 = arith.constant 0 : i32
    return %arg0, %c0_i32, %c0_i32_0 : i32, i32, i32
  }
  func.func @transform_3(%arg0: i32, %arg1: memref<2xf32, #tpu.memory_space<smem>>) -> (i32, i32, i32) {
    %c0_i32 = arith.constant 0 : i32
    %c0_i32_0 = arith.constant 0 : i32
    %c0_i32_1 = arith.constant 0 : i32
    return %arg0, %c0_i32, %c0_i32_0 : i32, i32, i32
  }
  func.func @transform_4(%arg0: i32, %arg1: memref<2xf32, #tpu.memory_space<smem>>) -> (i32, i32) {
    %c0_i32 = arith.constant 0 : i32
    %c0_i32_0 = arith.constant 0 : i32
    %c0_i32_1 = arith.constant 0 : i32
    return %c0_i32, %c0_i32_0 : i32, i32
  }
  func.func @transform_5(%arg0: i32, %arg1: memref<2xf32, #tpu.memory_space<smem>>) -> (i32, i32) {
    %c0_i32 = arith.constant 0 : i32
    %c0_i32_0 = arith.constant 0 : i32
    %c0_i32_1 = arith.constant 0 : i32
    return %c0_i32, %c0_i32_0 : i32, i32
  }
  func.func @transform_6(%arg0: i32, %arg1: memref<2xf32, #tpu.memory_space<smem>>) -> (i32, i32) {
    %c0_i32 = arith.constant 0 : i32
    %c0_i32_0 = arith.constant 0 : i32
    %c0_i32_1 = arith.constant 0 : i32
    return %c0_i32, %c0_i32_0 : i32, i32
  }
  func.func @transform_7(%arg0: i32, %arg1: memref<2xf32, #tpu.memory_space<smem>>) -> (i32, i32, i32) {
    %c0_i32 = arith.constant 0 : i32
    %c0_i32_0 = arith.constant 0 : i32
    %c0_i32_1 = arith.constant 0 : i32
    return %arg0, %c0_i32, %c0_i32_0 : i32, i32, i32
  }
}

</mosaic_0001>

<bundles_post_ra>
// kernel: beso_forward.1
= control target key start
LH: loop header
LB: loop body
LE: loop exit
PB: predicated region body
PF: predicated region fallthrough
CT: control target
= control target key end

     0   :  { %s1315_s0 = inlined_call_operand.vmem [shape: f32[2], index: 0, kind: input, shape index: {}]   ;;  %s1316_s1 = inlined_call_operand.vmem [shape: f32[2,8,128], index: 1, kind: input, shape index: {}]   ;;  %s1317_s2 = inlined_call_operand.vmem [shape: f32[2,8,32], index: 2, kind: input, shape index: {}]   ;;  %s1318_s3 = inlined_call_operand.vmem [shape: f32[2,8,32], index: 3, kind: input, shape index: {}]   ;;  %s1319_s4 = inlined_call_operand.vmem [shape: f32[2,1,16], index: 4, kind: input, shape index: {}]   ;;  %s1320_s5 = inlined_call_operand.vmem [shape: bf16[216,64], index: 5, kind: input, shape index: {}]   ;;  %s1321_s6 = inlined_call_operand.vmem [shape: bf16[72,64], index: 6, kind: input, shape index: {}]   ;;  %s1322_s7 = inlined_call_operand.vmem [shape: bf16[72,128], index: 7, kind: input, shape index: {}]   ;;  %s1323_s8 = inlined_call_operand.vmem [shape: f32[2,8,128], index: 8, kind: output, shape index: {}]  }
   0x1   :  { %s13_s29 = sshll.u32 %s1315_s0, 4  ;;  %s14_s29 = int_to_ptr.vmem [resolvable:$true] %s13_s29 }
   0x2   :  { %s1077_s30 = scalar_lea.vmem %s14_s29, 16  ;;  %p1082_p1 = scmp.lt.s32.totalorder %s14_s29, %s14_s29 }
   0x3   :  { %p1078_p0 = scmp.ne.s32.totalorder %s14_s29, %s1077_s30  ;;  %p1083_p2 = scmp.lt.s32.totalorder %s1077_s30, %s1077_s30 }
   0x5   :  { %p1084_p3 = por %p1083_p2, %p1082_p1 }
   0x7   :  { %p1085_p4 = pnand %p1084_p3, %p1078_p0 }
   0x9   :  { %1088 = shalt.err (!%p1085_p4)  }
   0xa   :  { %s1099_s9 = smov [#allocation3]  }
   0xb   :  { %16 = dma.vmem_to_smem %s14_s29, 16, %s1099_s9, [#allocation2] }
   0xc   :  { %1093 = dma.done.wait [#allocation2], 16 }
   0xd   :  { %1094 = vsyncadd [#allocation2], 4294967280 }
   0xe   :  { %18 = sfence }
   0xf   :  { %s1150_s10 = smov 0  }
  0x10 LB: > { %s1156_s0 = sadd.s32 4294967295, %s1097_s10   ;;  %p913_p5 = scmp.ge.s32.totalorder %s1097_s10, 1  ;;  %s1097_s10 = sphi %s1150_s10, %s24_s10  }
  0x11   : > { %p269_p6 = scmp.lt.s32.totalorder %s1097_s10, 3 }
  0x13   : > { %p270_p7 = pnand %p913_p5, %p269_p6 }
  0x14   : > { %v1050_v0 = vld [vmem:[%s1320_s5] sm:$0xff] (!%p270_p7)   ;;  %v1100_v1 = vmov (!%p270_p7), 0.0   ;;  %v1051_v2 = vld [vmem:[%s1320_s5 + $0x8] sm:$0xff] (!%p270_p7)   ;;  %vm1101_vm0 = vmmov (!%p270_p7), 0   ;;  %p310_p8 = scmp.lt.s32.totalorder (!%p270_p7), %s1156_s0, 1  ;;  %v1053_v5 = vld [vmem:[%s1320_s5 + $0x10] sm:$0xff] (!%p270_p7)   ;;  %v624_v39 = vlaneseq (!%p270_p7) }
  0x15   : > { %273 = sbr.rel (%p270_p7) target bundleno = 764 (0x2fc), region = 48  ;;  %981 = vmatprep.subr.bf16.mxu1 (!%p270_p7), %v1100_v1  ;;  %973 = vmatprep.subr.bf16.mxu0 (!%p270_p7), %v1100_v1  ;;  %v1052_v3 = vld [vmem:[%s1320_s5 + $0x40] sm:$0xff] (!%p270_p7)   ;;  %v1054_v4 = vld [vmem:[%s1320_s5 + $0x48] sm:$0xff] (!%p270_p7)   ;;  %vm378_vm1 = vcmask (!%p270_p7), 261120   ;;  %v1056_v6 = vld [vmem:[%s1320_s5 + $0x50] sm:$0xff] (!%p270_p7)   ;;  %s330_s28 = sld [smem:[#allocation3 + %s1156_s0]] (!%p270_p7) }
  0x16   : > { %982 = vmatpush3.bf16.msra.mxu1 (!%p270_p7), %v1050_v0  ;;  %977 = vmatprep.mubr.msk.bf16.mxu0 (!%p270_p7), %vm1101_vm0, %v1100_v1  ;;  %v1055_v9 = vld [vmem:[%s1320_s5 + $0x18] sm:$0xff] (!%p270_p7)   ;;  %v1057_v12 = vld [vmem:[%s1320_s5 + $0x20] sm:$0xff] (!%p270_p7)   ;;  %v1059_v17 = vld [vmem:[%s1320_s5 + $0x28] sm:$0xff] (!%p270_p7)   ;;  %vm580_vm2 = vcmask (!%p270_p7), 130048   ;;  %v625_v41 = vshrl.u32 (!%p270_p7), %v624_v39, 7  ;;  %vm684_vm3 = vcmask (!%p270_p7), 523264  }
  0x17   : > { %983 = vmatprep.subr.bf16.mxu1 (!%p270_p7), %v1100_v1  ;;  %997 = vmatprep.mubr.msk.bf16.mxu1 (!%p270_p7), %vm1101_vm0, %v1100_v1  ;;  %v1058_v10 = vld [vmem:[%s1320_s5 + $0x58] sm:$0xff] (!%p270_p7)   ;;  %v1061_v13 = vld [vmem:[%s1320_s5 + $0x60] sm:$0xff] (!%p270_p7)   ;;  %v1060_v20 = vld [vmem:[%s1320_s5 + $0x30] sm:$0xff] (!%p270_p7)  }
  0x18   : > { %974 = vmatpush3.bf16.msra.mxu0 (!%p270_p7), %v1052_v3  ;;  %v1062_v22 = vld [vmem:[%s1320_s5 + $0x38] sm:$0xff] (!%p270_p7)   ;;  %v1063_v27 = vld [vmem:[%s1321_s6] sm:$0xff] (!%p270_p7)   ;;  %v1064_v28 = vld [vmem:[%s1321_s6 + $0x8] sm:$0xff] (!%p270_p7)   ;;  %v626_v46 = vsub.s32 (!%p270_p7), 0, %v625_v41 }
  0x19   : > { %975 = vmatprep.subr.bf16.mxu0 (!%p270_p7), %v1100_v1  ;;  %v1065_v29 = vld [vmem:[%s1321_s6 + $0x10] sm:$0xff] (!%p270_p7)   ;;  %v1066_v30 = vld [vmem:[%s1321_s6 + $0x18] sm:$0xff] (!%p270_p7)   ;;  %v629_v44 = vld [vmem:[%s1320_s5 + $0x68] sm:$0x1] (!%p270_p7) }
  0x1a   : > { %984 = vmatpush3.bf16.msra.mxu1 (!%p270_p7), %v1051_v2  ;;  %v630_v47 = vunpack.c.l.bf16 (!%p270_p7), %v629_v44 }
  0x1b   : > { %985 = vmatprep.subr.bf16.mxu1 (!%p270_p7), %v1100_v1  ;;  %v1221_v14 = vstv (!%p270_p7), %s330_s28 }
  0x1c   : > { %s1181_s19 = scalar_select %p310_p8, %s1156_s0, 1  ;;  %976 = vmatpush3.bf16.msra.mxu0 %v1054_v4  ;;  %v332_v16 = vmul.f32 %v1221_v14, %v1221_v14  ;;  %v634_v54 = vrot.slane %v630_v47, %v626_v46 }
  0x1d   : > { %1001 = vmatprep.subr.bf16.mxu0 %v1100_v1 }
  0x1e   : > { %s1188_s22 = sshll.u32 %s1181_s19, 3  ;;  %986 = vmatpush3.bf16.msra.mxu1 %v1053_v5  ;;  %s324_s24 = scalar_lea.vmem %s1319_s4, %s1181_s19  ;;  %v333_v18 = vadd.f32 0.25, %v332_v16  ;;  %v1067_v5 = vld [vmem:[%s1322_s7] sm:$0xff]  }
  0x1f   : > { %s317_s25 = scalar_lea.vmem %s1317_s2, %s1188_s22  ;;  %s321_s9 = scalar_lea.vmem %s1318_s3, %s1188_s22  ;;  %987 = vmatprep.subr.bf16.mxu1 %v1100_v1  ;;  %v342_v19 = vld [vmem:[%s324_s24] sm:$0x1] }
  0x20   : > { %v340_v7 = vld [vmem:[%s317_s25] sm:$0xff]  ;;  %1071 = vrsqrt.f32 %v333_v18  ;;  %v573_v21 = vpack.c.bf16 %v342_v19, %v342_v19  ;;  %s313_s28 = scalar_lea.vmem %s1316_s1, %s1188_s22  ;;  %s328_s13 = scalar_lea.vmem %s1323_s8, %s1188_s22 }
  0x21   : > { %v365_v8 = vpack.c.bf16 %v340_v7, %v340_v7  ;;  %v341_v11 = vld [vmem:[%s321_s9] sm:$0xff]  ;;  %v1069_v7 = vld [vmem:[%s1322_s7 + $0x10] sm:$0xff]  }
  0x22   : > { %988 = vmatpush3.bf16.msra.mxu1 %v1055_v9  ;;  %v514_v15 = vpack.c.bf16 %v341_v11, %v341_v11  ;;  %v1251_v23 = vld [vmem:[%s313_s28] sm:$0xff] }
  0x23   : > { %978 = vmatmul.mubr.msk.bf16.vlgmr.msra.gmra.mrb[0].mxu0 %vm378_vm1, %v365_v8  ;;  %989 = vmatprep.subr.bf16.mxu1 %v1100_v1  ;;  %v1070_v8 = vld [vmem:[%s1322_s7 + $0x18] sm:$0xff]   ;;  %v654_v9 = vld [vmem:[%s1321_s6 + $0x20] sm:$0x1] }
  0x24   : > { %1002 = vmatpush3.bf16.msra.mxu0 %v1056_v6  ;;  %1005 = vmatprep.mubr.msk.bf16.mxu0 %vm1101_vm0, %v1100_v1  ;;  %v1068_v6 = vld [vmem:[%s1322_s7 + $0x8] sm:$0xff]  }
  0x25   : > { %1003 = vmatprep.subr.bf16.mxu0 %v1100_v1 }
  0x26   : > { %990 = vmatpush3.bf16.msra.mxu1 %v1057_v12 }
  0x27   : > { %991 = vmatprep.subr.bf16.mxu1 %v1100_v1 }
  0x28   : > { %1004 = vmatpush3.bf16.msra.mxu0 %v1058_v10  ;;  %v655_v10 = vunpack.c.l.bf16 %v654_v9 }
  0x29   : > { %1009 = vmatprep.subr.bf16.mxu0 %v1100_v1 }
  0x2a   : > { %992 = vmatpush3.bf16.msra.mxu1 %v1059_v17  ;;  %v1255_v24 = vpop.eup %1071  ;;  %v659_v11 = vrot.slane %v655_v10, %v626_v46 }
  0x2b   : > { %1006 = vmatmul.mubr.msk.bf16.vlgmr.msra.gmra.mrb[4].mxu0 %vm378_vm1, %v514_v15  ;;  %993 = vmatprep.subr.bf16.mxu1 %v1100_v1  ;;  %v343_v25 = vmul.f32 %v1255_v24, %v1251_v23 }
  0x2c   : > { %1010 = vmatpush3.bf16.msra.mxu0 %v1061_v13  ;;  %1011 = vmatprep.mubr.msk.bf16.mxu0 %vm1101_vm0, %v1100_v1 }
  0x2d   : > { %1015 = vmatprep.subr.bf16.mxu0 %v1100_v1  ;;  %v360_v26 = vpack.c.bf16 %v343_v25, %v343_v25 }
  0x2e   : > { %994 = vmatpush3.bf16.msra.mxu1 %v1060_v20 }
  0x2f   : > { %995 = vmatprep.subr.bf16.mxu1 %v1100_v1 }
  0x32   : > { %996 = vmatpush3.bf16.msra.mxu1 %v1062_v22 }
  0x33   : > { %1012 = vmatmul.mubr.msk.bf16.vlgmr.msra.gmra.mrb[8].mxu0 %vm580_vm2, %v573_v21  ;;  %1027 = vmatprep.subr.bf16.mxu1 %v1100_v1 }
  0x34   : > { %1023 = vmatprep.mubr.msk.bf16.mxu0 %vm1101_vm0, %v1100_v1  ;;  %1016 = vmatpush3.bf16.msra.mxu0 %v1063_v27 }
  0x35   : > { %998 = vmatmul.mubr.bf16.vlgmr.msra.gmra.mrb[0].mxu1 %v360_v26  ;;  %1017 = vmatprep.subr.bf16.mxu0 %v1100_v1 }
  0x36   : > { %1035 = vmatprep.mubr.msk.bf16.mxu1 %vm1101_vm0, %v1100_v1  ;;  %1028 = vmatpush3.bf16.msra.mxu1 %v1067_v5 }
  0x37   : > { %1029 = vmatprep.subr.bf16.mxu1 %v1100_v1 }
  0x38   : > { %1018 = vmatpush3.bf16.msra.mxu0 %v1064_v28 }
  0x39   : > { %1019 = vmatprep.subr.bf16.mxu0 %v1100_v1 }
  0x3a   : > { %1030 = vmatpush3.bf16.msra.mxu1 %v1068_v6 }
  0x3b   : > { %1031 = vmatprep.subr.bf16.mxu1 %v1100_v1 }
  0x3c   : > { %1020 = vmatpush3.bf16.msra.mxu0 %v1065_v29  ;;  %v746_v29 = vld [vmem:[%s1322_s7 + $0x20] sm:$0x1] }
  0x3d   : > { %1021 = vmatprep.subr.bf16.mxu0 %v1100_v1 }
  0x3e   : > { %1032 = vmatpush3.bf16.msra.mxu1 %v1069_v7 }
  0x3f   : > { %1033 = vmatprep.subr.bf16.mxu1 %v1100_v1 }
  0x40   : > { %1022 = vmatpush3.bf16.msra.mxu0 %v1066_v30  ;;  %v335_v30 = vmul.f32 %v1255_v24, %v1255_v24 }
  0x42   : > { %1034 = vmatpush3.bf16.msra.mxu1 %v1070_v8 }
  0xf6   : > { %v416_v31 = vpop.f32.mrb[0].mxu0 }
  0xf7   : > { %v979_v32 = vpop.f32.mrb[1].mxu0 }
  0xf8   : > { %v419_v33 = vpop.f32.mrb[2].mxu0  ;;  %v337_v32 = vmul.f32 0.5, %v1221_v14 }
  0xf9   : > { %v980_v34 = vpop.f32.mrb[3].mxu0  ;;  %v336_v33 = vmul.f32 0.25, %v335_v30 }
  0xfe   : > { %v564_v35 = vpop.f32.mrb[4].mxu0 }
  0xff   : > { %v1007_v36 = vpop.f32.mrb[5].mxu0 }
 0x100   : > { %v567_v37 = vpop.f32.mrb[6].mxu0 }
 0x101   : > { %v1008_v38 = vpop.f32.mrb[7].mxu0 }
 0x102   : > { %v819_v38 = vmul.f32 %v1251_v23, %v336_v33 }
 0x106   : > { %v618_v40 = vpop.f32.mrb[8].mxu0 }
 0x107   : > { %v1013_v42 = vpop.f32.mrb[9].mxu0  ;;  %v627_v49 = vrot.slane %v618_v40, %v626_v46 }
 0x108   : > { %v621_v43 = vpop.f32.mrb[10].mxu0  ;;  %v504_v48 = vpop.f32.mrb[0].mxu1 }
 0x109   : > { %v1014_v45 = vpop.f32.mrb[11].mxu0  ;;  %v505_v50 = vadd.f32 %v504_v48, %v416_v31  ;;  %v999_v51 = vpop.f32.mrb[1].mxu1  ;;  %v747_v31 = vunpack.c.l.bf16 %v746_v29 }
 0x10a   : > { %v507_v52 = vpop.f32.mrb[2].mxu1 }
 0x10b   : > { %v570_v53 = vadd.f32 %v564_v35, %v505_v50  ;;  %v1000_v55 = vpop.f32.mrb[3].mxu1  ;;  %v751_v34 = vrot.slane %v747_v31, %v626_v46  ;;  %v338_v35 = vmul.f32 %v1255_v24, %v337_v32 }
 0x10d   : > { %v628_v56 = vadd.f32 %v627_v49, %v570_v53 }
 0x10f   : > { %v635_v57 = vadd.f32 %v634_v54, %v628_v56 }
 0x111   : > { %v636_v58 = vmul.f32 %v635_v57, %v635_v57 }
 0x113   : > { %v637_v59 = vmul.f32 %v636_v58, %v635_v57 }
 0x115   : > { %v638_v60 = vmul.f32 0.044715, %v637_v59 }
 0x117   : > { %v639_v61 = vadd.f32 %v638_v60, %v635_v57 }
 0x119   : > { %v640_v62 = vmul.f32 0.7978846, %v639_v61 }
 0x11b   : > { %1073 = vtanh.f32 %v640_v62 }
 0x125   : > { %v1074_v63 = vpop.eup %1073 }
 0x126   : > { %v642_v0 = vadd.f32 1.0, %v1074_v63 }
 0x128   : > { %v643_v2 = vmul.f32 0.5, %v642_v0 }
 0x12a   : > { %v644_v3 = vmul.f32 %v643_v2, %v635_v57 }
 0x12c   : > { %v653_v4 = vpack.c.bf16 %v644_v3, %v644_v3 }
 0x12e   : > { %1024 = vmatmul.mubr.msk.bf16.vlgmr.msra.gmra.mrb[12].mxu0 %vm684_vm3, %v653_v4 }
 0x201   : > { %v722_v12 = vpop.f32.mrb[12].mxu0 }
 0x202   : > { %v723_v13 = vadd.f32 %v722_v12, %v659_v11  ;;  %v1025_v15 = vpop.f32.mrb[13].mxu0 }
 0x203   : > { %v725_v16 = vpop.f32.mrb[14].mxu0 }
 0x204   : > { %v728_v17 = vmul.f32 %v723_v13, %v723_v13  ;;  %v1026_v18 = vpop.f32.mrb[15].mxu0 }
 0x206   : > { %v729_v19 = vmul.f32 %v728_v17, %v723_v13 }
 0x208   : > { %v730_v20 = vmul.f32 0.044715, %v729_v19 }
 0x20a   : > { %v731_v1 = vadd.f32 %v730_v20, %v723_v13 }
 0x20c   : > { %v732_v21 = vmul.f32 0.7978846, %v731_v1 }
 0x20e   : > { %1075 = vtanh.f32 %v732_v21 }
 0x218   : > { %v1076_v22 = vpop.eup %1075 }
 0x219   : > { %v734_v25 = vadd.f32 1.0, %v1076_v22 }
 0x21b   : > { %v735_v26 = vmul.f32 0.5, %v734_v25 }
 0x21d   : > { %v736_v27 = vmul.f32 %v735_v26, %v723_v13 }
 0x21f   : > { %v745_v28 = vpack.c.bf16 %v736_v27, %v736_v27 }
 0x221   : > { %1036 = vmatmul.mubr.msk.bf16.vlgmr.msra.gmra.mrb[4].mxu1 %vm684_vm3, %v745_v28 }
 0x2f4   : > { %v813_v36 = vpop.f32.mrb[4].mxu1 }
 0x2f5   : > { %v814_v37 = vadd.f32 %v813_v36, %v751_v34  ;;  %v1037_v39 = vpop.f32.mrb[5].mxu1 }
 0x2f6   : > { %v816_v40 = vpop.f32.mrb[6].mxu1 }
 0x2f7   : > { %v820_v41 = vmul.f32 %v814_v37, %v338_v35  ;;  %v1038_v42 = vpop.f32.mrb[7].mxu1 }
 0x2f9   : > { %v821_v43 = vadd.f32 %v820_v41, %v819_v38 }
 0x2fb   : > { %822 = vst [vmem:[%s328_s13] sm:$0xff] %v821_v43 }
 0x2fc PF: > { %s24_s10 = sadd.s32 1, %s1097_s10  }
 0x2fd   : > { %p21_p9 = scmp.ge.s32.totalorder %s24_s10, 4  }
 0x2ff   :  { %23 = sbr.rel (!%p21_p9) target bundleno = 16 (0x10), region = 87 }

</bundles_post_ra>
